<compile_context>
chip_gen: v6e
topology: v6e:2x2x1
jax: 0.10.0
libtpu: 0.0.40
codegen_flags: <defaults>
</compile_context>

<pallas_src>
import functools

import jax
import jax.numpy as jnp
from jax.experimental import pallas as pl
from jax.experimental.pallas import tpu as pltpu


# ---------------------------------------------------------------------------
# Kernel 1: fused feature transform  xz = x_aug @ w_cat  ->  (xr bf16, xob f32)
# ---------------------------------------------------------------------------
def feature_kernel(xa_ref, wcat_ref, xr_ref, xob_ref):
    xz = jnp.dot(xa_ref[...], wcat_ref[...], preferred_element_type=jnp.float32)
    h = xr_ref.shape[-1]
    xr_ref[...] = xz[:, :h].astype(jnp.bfloat16)   # rel half -> bf16 MXU operand
    xob_ref[...] = xz[:, h:]                       # root half + b_rel, stays f32


# ---------------------------------------------------------------------------
# Kernel 2: tiled neighborhood aggregation + PReLU
#   acc(i) = sum_k adj(i, k) @ xr(k);   h(i) = PReLU(acc(i) + xob(i))
# ---------------------------------------------------------------------------
def aggregate_prelu_kernel(alpha_ref, adj_ref, xr_ref, xob_ref, h_ref, acc_ref):
    k = pl.program_id(1)

    @pl.when(k == 0)
    def _():
        acc_ref[...] = jnp.zeros_like(acc_ref)

    acc_ref[...] += jnp.dot(adj_ref[...], xr_ref[...],
                            preferred_element_type=jnp.float32)

    @pl.when(k == pl.num_programs(1) - 1)
    def _():
        h = acc_ref[...] + xob_ref[...]
        a = alpha_ref[0]                      # shared PReLU alpha from SMEM
        h_ref[...] = jnp.where(h >= 0.0, h, a * h)


# ---------------------------------------------------------------------------
# Kernel 3: global mean pool (P @ h) + output linear
# ---------------------------------------------------------------------------
def pool_linout_kernel(pool_ref, h_ref, w_ref, b_ref, out_ref, *, vpu_out):
    pooled = jnp.dot(pool_ref[...], h_ref[...], preferred_element_type=jnp.float32)
    if vpu_out:
        # out_channels == 1: w_ref is [1, H]; lane reduction avoids a 1-lane MXU pass.
        out = jnp.sum(pooled * w_ref[...], axis=-1, keepdims=True)
    else:
        out = jnp.dot(pooled, w_ref[...], preferred_element_type=jnp.float32)
    out_ref[...] = out + b_ref[...]


# ---------------------------------------------------------------------------
# Helpers / wrapper
# ---------------------------------------------------------------------------
def _pick_tile(n, pref, align):
    """Largest multiple of `align` <= pref that divides n; else the full dim n."""
    t = min(pref, n)
    t -= t % align
    while t >= align:
        if n % t == 0:
            return t
        t -= align
    return n


def init_params(key, in_features, hidden_channels, out_channels):
    k1, k2, k3, k4 = jax.random.split(key, 4)
    scale_rel = 1.0 / jnp.sqrt(jnp.float32(in_features))
    scale_out = 1.0 / jnp.sqrt(jnp.float32(hidden_channels))
    return {
        # GraphConv.lin_rel (has bias) and GraphConv.lin_root (no bias)
        "w_rel": jax.random.uniform(k1, (in_features, hidden_channels),
                                    jnp.float32, -scale_rel, scale_rel),
        "b_rel": jax.random.uniform(k2, (1, hidden_channels),
                                    jnp.float32, -scale_rel, scale_rel),
        "w_root": jax.random.uniform(k3, (in_features, hidden_channels),
                                     jnp.float32, -scale_rel, scale_rel),
        # PReLU default init (single shared alpha)
        "prelu_alpha": jnp.full((1,), 0.25, jnp.float32),
        # lin_out
        "w_out": jax.random.uniform(k4, (hidden_channels, out_channels),
                                    jnp.float32, -scale_out, scale_out),
        "b_out": jnp.zeros((1, out_channels), jnp.float32),
    }


def simple_higher_order_gnn_efg(x, edge_index, batch, params, num_graphs,
                                *, tm=256, tk=512, tn=512):
    N, F = x.shape
    H = params["w_rel"].shape[1]
    O = params["w_out"].shape[1]

    # ---- wrapper glue: dense adjacency (edge multiplicity), pooling matrix ----
    src, dst = edge_index[0], edge_index[1]
    adj = jnp.zeros((N, N), jnp.float32).at[dst, src].add(1.0)
    adj_bf16 = adj.astype(jnp.bfloat16)      # small integer counts -> exact in bf16

    onehot = (batch[None, :] == jnp.arange(num_graphs)[:, None]).astype(jnp.float32)
    counts = jnp.maximum(onehot.sum(axis=1, keepdims=True), 1.0)
    pool = onehot / counts                   # P[g, i] = 1/|V_g| if batch[i] == g

    # w_cat = [[W_rel, W_root], [0, b_rel]]; the appended ones-column folds b_rel in.
    w_cat = jnp.concatenate([
        jnp.concatenate([params["w_rel"], jnp.zeros((1, H), jnp.float32)], axis=0),
        jnp.concatenate([params["w_root"], params["b_rel"]], axis=0),
    ], axis=1)                                                     # [F+1, 2H]
    x_aug = jnp.concatenate([x, jnp.ones((N, 1), jnp.float32)], axis=1)  # [N, F+1]

    # ---- tile sizes (kept well under 32 MiB scoped VMEM w/ double buffering,
    #      so the same tiling is safe on v7x's 64 MiB physical VMEM) ----
    TM = _pick_tile(N, tm, 8)     # node-row tile (output rows of the big matmul)
    TK = _pick_tile(N, tk, 128)   # reduction tile (lanes of the adj block)
    TN = _pick_tile(N, tn, 8)     # node tile for the feature transform
    Fp1, H2 = F + 1, 2 * H

    # ---- call 1: xz = x_aug @ w_cat  ->  xr (bf16), xob (f32) ----
    xr, xob = pl.pallas_call(
        feature_kernel,
        out_shape=(jax.ShapeDtypeStruct((N, H), jnp.bfloat16),
                   jax.ShapeDtypeStruct((N, H), jnp.float32)),
        grid=(N // TN,),
        in_specs=[pl.BlockSpec((TN, Fp1), lambda i: (i, 0)),
                  pl.BlockSpec((Fp1, H2), lambda i: (0, 0))],
        out_specs=(pl.BlockSpec((TN, H), lambda i: (i, 0)),
                   pl.BlockSpec((TN, H), lambda i: (i, 0))),
        compiler_params=pltpu.CompilerParams(
            dimension_semantics=("parallel",)),
    )(x_aug, w_cat)

    # ---- call 2: h = PReLU(adj @ xr + xob), tiled with f32 accumulator ----
    h = pl.pallas_call(
        aggregate_prelu_kernel,
        out_shape=jax.ShapeDtypeStruct((N, H), jnp.float32),
        grid=(N // TM, N // TK),
        in_specs=[pl.BlockSpec(memory_space=pltpu.MemorySpace.SMEM),   # alpha (1,)
                  pl.BlockSpec((TM, TK), lambda i, k: (i, k)),         # adj  (bf16)
                  pl.BlockSpec((TK, H), lambda i, k: (k, 0)),          # xr   (bf16)
                  pl.BlockSpec((TM, H), lambda i, k: (i, 0))],         # xob  (f32)
        out_specs=pl.BlockSpec((TM, H), lambda i, k: (i, 0)),
        scratch_shapes=[pltpu.VMEM((TM, H), jnp.float32)],
        compiler_params=pltpu.CompilerParams(
            dimension_semantics=("parallel", "arbitrary")),
    )(params["prelu_alpha"], adj_bf16, xr, xob)

    # ---- call 3: pooled = P @ h ; out = pooled @ W_out + b_out ----
    vpu_out = (O == 1)
    w_out_k = params["w_out"].T if vpu_out else params["w_out"]   # [1,H] or [H,O]
    vmem = pl.BlockSpec(memory_space=pltpu.MemorySpace.VMEM)
    out = pl.pallas_call(
        functools.partial(pool_linout_kernel, vpu_out=vpu_out),
        out_shape=jax.ShapeDtypeStruct((num_graphs, O), jnp.float32),
        in_specs=[vmem, vmem, vmem, vmem],
        out_specs=vmem,
    )(pool, h, w_out_k, params["b_out"])
    return out


def reference_forward(x, edge_index, batch, params, num_graphs):
    with jax.default_matmul_precision("highest"):
        N = x.shape[0]
        src, dst = edge_index[0], edge_index[1]
        adj = jnp.zeros((N, N), jnp.float32).at[dst, src].add(1.0)
        agg = adj @ x
        h = agg @ params["w_rel"] + params["b_rel"] + x @ params["w_root"]
        a = params["prelu_alpha"][0]
        h = jnp.where(h >= 0.0, h, a * h)
        onehot = (batch[None, :] == jnp.arange(num_graphs)[:, None]).astype(jnp.float32)
        counts = jnp.maximum(onehot.sum(axis=1, keepdims=True), 1.0)
        pooled = (onehot / counts) @ h
        return pooled @ params["w_out"] + params["b_out"]


if __name__ == "__main__":
    # Small but non-trivial shapes so the tiled grid actually exercises multiple
    # row blocks (parallel axis) and multiple K blocks (accumulation axis):
    # 256 nodes, 16 input features, 2048 edges, 4 graphs, hidden=64, out=1.
    N, F_IN, E, G = 256, 16, 2048, 4
    HIDDEN, OUT = 64, 1

    key = jax.random.PRNGKey(0)
    kx, ke_src, ke_dst, kp = jax.random.split(key, 4)

    x = jax.random.normal(kx, (N, F_IN), jnp.float32)
    edge_index = jnp.stack([
        jax.random.randint(ke_src, (E,), 0, N, jnp.int32),
        jax.random.randint(ke_dst, (E,), 0, N, jnp.int32),
    ], axis=0)
    batch = jnp.repeat(jnp.arange(G, dtype=jnp.int32), N // G)

    params = init_params(kp, F_IN, HIDDEN, OUT)

    out = simple_higher_order_gnn_efg(x, edge_index, batch, params, G,
                                      tm=64, tk=128, tn=64)   # grid (4, 2)
    out = jax.block_until_ready(out)

    ref = reference_forward(x, edge_index, batch, params, G)
    assert out.shape == (G, OUT)
    # adj / xr are bf16 MXU operands (f32 accumulation), so compare loosely
    # against the pure-f32 reference.
    assert jnp.allclose(out, ref, atol=2e-2, rtol=2e-2), (out, ref)

    print("KERNEL_OK")
</pallas_src>

<mosaic_0001>
module attributes {stable_mosaic.version = 11 : i64} {
  func.func @feature_kernel(%arg0: i32, %arg1: memref<64x17xf32, #tpu.memory_space<vmem>>, %arg2: memref<17x128xf32, #tpu.memory_space<vmem>>, %arg3: memref<64x64xbf16, #tpu.memory_space<vmem>>, %arg4: memref<64x64xf32, #tpu.memory_space<vmem>>) attributes {dimension_semantics = [#tpu.dimension_semantics<parallel>], iteration_bounds = array<i64: 4>, scalar_prefetch = 0 : i64, scratch_operands = 0 : i64, tpu.core_type = #tpu.core_type<tc>, window_params = [{transform_indices = @transform_0, window_bounds = array<i64: 64, 17>}, {pipeline_mode = #tpu.pipeline_mode<synchronous>, transform_indices = @transform_1, window_bounds = array<i64: 17, 128>}, {transform_indices = @transform_2, window_bounds = array<i64: 64, 64>}, {transform_indices = @transform_3, window_bounds = array<i64: 64, 64>}]} {
    %c0 = arith.constant 0 : index
    %c0_0 = arith.constant 0 : index
    %0 = vector.load %arg1[%c0, %c0_0] : memref<64x17xf32, #tpu.memory_space<vmem>>, vector<64x17xf32>
    %c0_1 = arith.constant 0 : index
    %c0_2 = arith.constant 0 : index
    %1 = vector.load %arg2[%c0_1, %c0_2] : memref<17x128xf32, #tpu.memory_space<vmem>>, vector<17x128xf32>
    %cst = arith.constant dense<0.000000e+00> : vector<64x128xf32>
    %2 = tpu.matmul %0, %1, %cst {dimension_numbers = #tpu.dot_dimension_numbers<[1], [0], [0], [1], [0, 0, 1, 1], [], []>} : vector<64x17xf32>, vector<17x128xf32>, vector<64x128xf32> -> vector<64x128xf32>
    %3 = vector.extract_strided_slice %2 {offsets = [0, 0], sizes = [64, 64], strides = [1, 1]} : vector<64x128xf32> to vector<64x64xf32>
    %4 = arith.truncf %3 : vector<64x64xf32> to vector<64x64xbf16>
    %c0_3 = arith.constant 0 : index
    %c0_4 = arith.constant 0 : index
    %5 = vector.load %arg3[%c0_3, %c0_4] : memref<64x64xbf16, #tpu.memory_space<vmem>>, vector<64x64xbf16>
    tpu.vector_store %arg3[%c0_3, %c0_4], %4 {strides = array<i32>} : memref<64x64xbf16, #tpu.memory_space<vmem>>, vector<64x64xbf16>,
    %6 = vector.extract_strided_slice %2 {offsets = [0, 64], sizes = [64, 64], strides = [1, 1]} : vector<64x128xf32> to vector<64x64xf32>
    %c0_5 = arith.constant 0 : index
    %c0_6 = arith.constant 0 : index
    %7 = vector.load %arg4[%c0_5, %c0_6] : memref<64x64xf32, #tpu.memory_space<vmem>>, vector<64x64xf32>
    tpu.vector_store %arg4[%c0_5, %c0_6], %6 {strides = array<i32>} : memref<64x64xf32, #tpu.memory_space<vmem>>, vector<64x64xf32>,
    return
  }
  func.func @transform_0(%arg0: i32) -> (i32, i32) {
    %c0_i32 = arith.constant 0 : i32
    %c0_i32_0 = arith.constant 0 : i32
    return %arg0, %c0_i32 : i32, i32
  }
  func.func @transform_1(%arg0: i32) -> (i32, i32) {
    %c0_i32 = arith.constant 0 : i32
    %c0_i32_0 = arith.constant 0 : i32
    %c0_i32_1 = arith.constant 0 : i32
    return %c0_i32, %c0_i32_0 : i32, i32
  }
  func.func @transform_2(%arg0: i32) -> (i32, i32) {
    %c0_i32 = arith.constant 0 : i32
    %c0_i32_0 = arith.constant 0 : i32
    return %arg0, %c0_i32 : i32, i32
  }
  func.func @transform_3(%arg0: i32) -> (i32, i32) {
    %c0_i32 = arith.constant 0 : i32
    %c0_i32_0 = arith.constant 0 : i32
    return %arg0, %c0_i32 : i32, i32
  }
}

</mosaic_0001>

<bundles_post_ra>
// kernel: tpu_custom_call.1
= control target key start
LH: loop header
LB: loop body
LE: loop exit
PB: predicated region body
PF: predicated region fallthrough
CT: control target
= control target key end

     0   :  { %s616_s12 = smov 0   ;;  %s687_s0 = inlined_call_operand.vmem [shape: f32[256,17], index: 0, kind: input, shape index: {}]   ;;  %s688_s1 = inlined_call_operand.vmem [shape: f32[17,128], index: 1, kind: input, shape index: {}]   ;;  %s689_s2 = inlined_call_operand.vmem [shape: bf16[256,64], index: 2, kind: output, shape index: {0}]   ;;  %s690_s3 = inlined_call_operand.vmem [shape: f32[256,64], index: 3, kind: output, shape index: {1}]  }
   0x1 LB: > { %s505_s13 = sadd.s32 4294967295, %s593_s12   ;;  %p509_p0 = scmp.ge.s32.totalorder %s593_s12, 1  ;;  %s593_s12 = sphi %s616_s12, %s14_s12  }
   0x2   : > { %p141_p1 = scmp.lt.s32.totalorder %s593_s12, 5 }
   0x4   : > { %p142_p2 = pnand %p509_p0, %p141_p1 }
   0x5   : > { %s510_s18 = sshll.u32 (!%p142_p2), %s505_s13, 3  ;;  %s595_s29 = smov (!%p142_p2), 64  }
   0x6   : > { %145 = sbr.rel (%p142_p2) target bundleno = 340 (0x154), region = 28  ;;  %p171_p3 = scmp.lt.s32.totalorder (!%p142_p2), %s510_s18, 31 }
   0xb   : > { %v198_v0 = vld [vmem:[%s688_s1 + $0x10] sm:$0x1]  ;;  %vm224_vm0 = vcmask 1040384   ;;  %v197_v1 = vld [vmem:[%s688_s1 + $0x8] sm:$0xff]  ;;  %v196_v2 = vld [vmem:[%s688_s1] sm:$0xff]  ;;  %s692_s18 = smov (!%p171_p3, %s510_s18), 31 }
   0xc   : > { %554 = vmatprep.subr.msk.mxu0 %vm224_vm0, %v198_v0  ;;  %572 = vmatprep.subr.msk.mxu1 %vm224_vm0, %v198_v0  ;;  %s511_s21 = sshll.u32 %s692_s18, 3  ;;  %vm199_vm1 = vcmask 138240   ;;  %s513_s25 = sshll.u32 %s692_s18, 2  ;;  %vm365_vm2 = vcmask 519168   ;;  %vm406_vm3 = vcmask 523264  }
   0xd   : > { %555 = vmatpush3.msk.msra.mxu0 %vm224_vm0, %v198_v0  ;;  %575 = vmatpush3.msk.msra.mxu1 %vm224_vm0, %v198_v0  ;;  %s174_s24 = scalar_lea.vmem %s687_s0, %s511_s21  ;;  %s653_s28 = scalar_lea.vmem %s689_s2, %s513_s25 }
   0xe   : > { %556 = vmatprep.subr.mxu0 %v197_v1  ;;  %573 = vmatprep.subr.mxu1 %v197_v1  ;;  %v188_v3 = vld [vmem:[%s174_s24] sm:$0xff]  ;;  %v189_v5 = vld [vmem:[%s174_s24 + $0x8] sm:$0xff]  ;;  %v190_v7 = vld [vmem:[%s174_s24 + $0x10] sm:$0xff]  ;;  %s186_s5 = scalar_lea.vmem %s690_s3, %s511_s21 }
   0xf   : > { %557 = vmatpush3.msra.mxu0 %v197_v1  ;;  %576 = vmatpush3.msra.mxu1 %v197_v1  ;;  %v192_v4 = vld [vmem:[%s174_s24 + $0x20] sm:$0xff]  ;;  %v193_v6 = vld [vmem:[%s174_s24 + $0x28] sm:$0xff]  ;;  %v194_v8 = vld [vmem:[%s174_s24 + $0x30] sm:$0xff] }
  0x10   : > { %558 = vmatprep.subr.mxu0 %v196_v2  ;;  %574 = vmatprep.subr.mxu1 %v196_v2  ;;  %v191_v9 = vld [vmem:[%s174_s24 + $0x18] sm:$0xff] }
  0x11   : > { %559 = vmatpush3.msra.mxu0 %v196_v2  ;;  %577 = vmatpush3.msra.mxu1 %v196_v2  ;;  %v195_v10 = vld [vmem:[%s174_s24 + $0x38] sm:$0xff] }
  0x12   : > { %560 = vmatprep.mubr.msk.f32.mxu0 %vm199_vm1, %v188_v3  ;;  %566 = vmatprep.mubr.msk.f32.mxu1 %vm199_vm1, %v192_v4 }
  0x13   : > { %561 = vmatmul.mubr.msk.f32.vlgmr.msra.gmra.mxu0 %vm199_vm1, %v189_v5  ;;  %567 = vmatmul.mubr.msk.f32.vlgmr.msra.gmra.mxu1 %vm199_vm1, %v193_v6 }
  0x14   : > { %563 = vmatprep.mubr.msk.f32.mxu0 %vm199_vm1, %v190_v7  ;;  %569 = vmatprep.mubr.msk.f32.mxu1 %vm199_vm1, %v194_v8 }
  0x17   : > { %564 = vmatmul.mubr.msk.f32.gmra.mxu0 %vm199_vm1, %v191_v9  ;;  %570 = vmatmul.mubr.msk.f32.gmra.mxu1 %vm199_vm1, %v195_v10 }
  0xd3   : > { %v562_v11 = vpop.f32.mrf.mxu0  ;;  %v568_v12 = vpop.f32.mrf.mxu1 }
  0xd4   : > { %v536_v13 = vpack.c.bf16 %v562_v11, %v562_v11  ;;  %v540_v14 = vpack.c.bf16 %v568_v12, %v568_v12  ;;  %392 = vrot.lane.b32.xlu1 %v568_v12, %s595_s29  ;;  %384 = vrot.lane.b32.xlu0 %v562_v11, %s595_s29 }
  0xd5   : > { %v294_v15 = vpop.f32.mrf.mxu0  ;;  %v314_v16 = vpop.f32.mrf.mxu1 }
  0xd6   : > { %367 = vst.msk [vmem:[%s653_s28 + $0x4] sm:$0xf] %vm365_vm2, %v536_v13  ;;  %371 = vst.msk [vmem:[%s653_s28 + $0x14] sm:$0xf] %vm365_vm2, %v540_v14  ;;  %v535_v17 = vpack.c.bf16 %v294_v15, %v294_v15  ;;  %v539_v18 = vpack.c.bf16 %v314_v16, %v314_v16 }
  0xd7   : > { %v565_v19 = vpop.f32.mrf.mxu0  ;;  %v571_v20 = vpop.f32.mrf.mxu1 }
  0xd8   : > { %366 = vst.msk [vmem:[%s653_s28] sm:$0xf] %vm365_vm2, %v535_v17  ;;  %370 = vst.msk [vmem:[%s653_s28 + $0x10] sm:$0xf] %vm365_vm2, %v539_v18  ;;  %v538_v21 = vpack.c.bf16 %v565_v19, %v565_v19  ;;  %382 = vrot.lane.b32.xlu0 %v294_v15, %s595_s29  ;;  %388 = vrot.lane.b32.xlu1 %v565_v19, %s595_s29  ;;  %v542_v22 = vpack.c.bf16 %v571_v20, %v571_v20 }
  0xd9   : > { %v304_v23 = vpop.f32.mrf.mxu0  ;;  %v324_v24 = vpop.f32.mrf.mxu1 }
  0xda   : > { %369 = vst.msk [vmem:[%s653_s28 + $0xc] sm:$0xf] %vm365_vm2, %v538_v21  ;;  %v537_v25 = vpack.c.bf16 %v304_v23, %v304_v23  ;;  %373 = vst.msk [vmem:[%s653_s28 + $0x1c] sm:$0xf] %vm365_vm2, %v542_v22  ;;  %v541_v26 = vpack.c.bf16 %v324_v24, %v324_v24 }
  0xdc   : > { %368 = vst.msk [vmem:[%s653_s28 + $0x8] sm:$0xf] %vm365_vm2, %v537_v25  ;;  %390 = vrot.lane.b32.xlu0 %v314_v16, %s595_s29  ;;  %386 = vrot.lane.b32.xlu1 %v304_v23, %s595_s29  ;;  %372 = vst.msk [vmem:[%s653_s28 + $0x18] sm:$0xf] %vm365_vm2, %v541_v26 }
  0xe0   : > { %394 = vrot.lane.b32.xlu0 %v324_v24, %s595_s29  ;;  %396 = vrot.lane.b32.xlu1 %v571_v20, %s595_s29 }
 0x146   : > { %v393_v27 = vpop.permute.xlu1 %392  ;;  %v385_v28 = vpop.permute.xlu0 %384 }
 0x147   : > { %412 = vst.msk [vmem:[%s186_s5 + $0x28] sm:$0xff] %vm406_vm3, %v393_v27  ;;  %408 = vst.msk [vmem:[%s186_s5 + $0x8] sm:$0xff] %vm406_vm3, %v385_v28 }
 0x14a   : > { %v383_v29 = vpop.permute.xlu0 %382  ;;  %v389_v30 = vpop.permute.xlu1 %388 }
 0x14b   : > { %407 = vst.msk [vmem:[%s186_s5] sm:$0xff] %vm406_vm3, %v383_v29  ;;  %410 = vst.msk [vmem:[%s186_s5 + $0x18] sm:$0xff] %vm406_vm3, %v389_v30 }
 0x14e   : > { %v391_v31 = vpop.permute.xlu0 %390  ;;  %v387_v32 = vpop.permute.xlu1 %386 }
 0x14f   : > { %411 = vst.msk [vmem:[%s186_s5 + $0x20] sm:$0xff] %vm406_vm3, %v391_v31  ;;  %409 = vst.msk [vmem:[%s186_s5 + $0x10] sm:$0xff] %vm406_vm3, %v387_v32 }
 0x152   : > { %v395_v33 = vpop.permute.xlu0 %394  ;;  %v397_v34 = vpop.permute.xlu1 %396 }
 0x153   : > { %413 = vst.msk [vmem:[%s186_s5 + $0x30] sm:$0xff] %vm406_vm3, %v395_v33  ;;  %414 = vst.msk [vmem:[%s186_s5 + $0x38] sm:$0xff] %vm406_vm3, %v397_v34 }
 0x154 PF: > { %s14_s12 = sadd.s32 1, %s593_s12  }
 0x155   : > { %p11_p4 = scmp.ge.s32.totalorder %s14_s12, 6  }
 0x157   :  { %13 = sbr.rel (!%p11_p4) target bundleno = 1 (0x1), region = 70 }

</bundles_post_ra>
